<compile_context>
chip_gen: v7x
topology: tpu7x:2x2x1
jax: 0.10.0
libtpu: 0.0.40
codegen_flags: <defaults>
</compile_context>

<pallas_src>
import jax
import jax.numpy as jnp
from jax.experimental import pallas as pl
from jax.experimental.pallas import tpu as pltpu


LANES = 128           # vreg lane width: keep the minor dim lane-dense
ROW_ALIGN = 32        # sublane alignment valid for f32 / bf16 / int8 packing
MAX_TILE_ROWS = 1024  # 1024x128 f32 = 512 KiB per buffer


def _identity_copy_kernel(x_ref, o_ref):
    o_ref[...] = x_ref[...]


def _make_identity_copy(rows_padded, tile_rows, dtype):
    grid = (rows_padded // tile_rows,)
    return pl.pallas_call(
        _identity_copy_kernel,
        out_shape=jax.ShapeDtypeStruct((rows_padded, LANES), dtype),
        grid=grid,
        in_specs=[pl.BlockSpec((tile_rows, LANES), lambda i: (i, 0))],
        out_specs=pl.BlockSpec((tile_rows, LANES), lambda i: (i, 0)),
        compiler_params=pltpu.CompilerParams(
            dimension_semantics=("parallel",),        # v7x: shard rows over both TCs
            vmem_limit_bytes=32 * 1024 * 1024,        # well under v5e/v6e/v7x limits
        ),
    )


def pallas_identity(x):
    """Identity.forward(inp) -> inp, routed through a tiled Pallas copy kernel."""
    orig_shape = x.shape
    flat = jnp.ravel(x)
    n = flat.size
    if n == 0:
        return x

    # Lane-dense 2-D slab: (rows, 128), rows padded so the tile divides evenly.
    rows = -(-n // LANES)
    tile_rows = min(MAX_TILE_ROWS,
                    ((rows + ROW_ALIGN - 1) // ROW_ALIGN) * ROW_ALIGN)
    rows_padded = ((rows + tile_rows - 1) // tile_rows) * tile_rows

    pad = rows_padded * LANES - n
    slab = jnp.pad(flat, (0, pad)).reshape(rows_padded, LANES)

    out = _make_identity_copy(rows_padded, tile_rows, x.dtype)(slab)
    return out.reshape(-1)[:n].reshape(orig_shape)


if __name__ == "__main__":
    key = jax.random.PRNGKey(0)
    # Small 4-D input (batch=2, channels=4, spatial=16x16), like a PyTorch tensor.
    x = jax.random.normal(key, (2, 4, 16, 16), dtype=jnp.float32)
    out = jax.block_until_ready(jax.jit(pallas_identity)(x))
    assert out.shape == x.shape, out.shape
    assert out.dtype == x.dtype, out.dtype
    assert bool(jnp.array_equal(out, x))
    print("KERNEL_OK")
</pallas_src>

<mosaic_0001>
module attributes {stable_mosaic.version = 11 : i64} {
  func.func @_identity_copy_kernel(%arg0: i32, %arg1: memref<32x128xf32, #tpu.memory_space<vmem>>, %arg2: memref<32x128xf32, #tpu.memory_space<vmem>>) attributes {dimension_semantics = [#tpu.dimension_semantics<parallel>], iteration_bounds = array<i64: 1>, scalar_prefetch = 0 : i64, scratch_operands = 0 : i64, tpu.core_type = #tpu.core_type<tc>, window_params = [{transform_indices = @transform_0, window_bounds = array<i64: 32, 128>}, {transform_indices = @transform_1, window_bounds = array<i64: 32, 128>}]} {
    %c0 = arith.constant 0 : index
    %c0_0 = arith.constant 0 : index
    %0 = vector.load %arg1[%c0, %c0_0] : memref<32x128xf32, #tpu.memory_space<vmem>>, vector<32x128xf32>
    %c0_1 = arith.constant 0 : index
    %c0_2 = arith.constant 0 : index
    %1 = vector.load %arg2[%c0_1, %c0_2] : memref<32x128xf32, #tpu.memory_space<vmem>>, vector<32x128xf32>
    tpu.vector_store %arg2[%c0_1, %c0_2], %0 {strides = array<i32>} : memref<32x128xf32, #tpu.memory_space<vmem>>, vector<32x128xf32>,
    return
  }
  func.func @transform_0(%arg0: i32) -> (i32, i32) {
    %c0_i32 = arith.constant 0 : i32
    %c0_i32_0 = arith.constant 0 : i32
    return %arg0, %c0_i32 : i32, i32
  }
  func.func @transform_1(%arg0: i32) -> (i32, i32) {
    %c0_i32 = arith.constant 0 : i32
    %c0_i32_0 = arith.constant 0 : i32
    return %arg0, %c0_i32 : i32, i32
  }
}

</mosaic_0001>

<bundles_post_ra>
// kernel: pallas_identity.1
= control target key start
LH: loop header
LB: loop body
LE: loop exit
PB: predicated region body
PF: predicated region fallthrough
CT: control target
= control target key end

     0   :  { %s54_s0 = inlined_call_operand.vmem [shape: f32[32,128], index: 0, kind: input, shape index: {}]   ;;  %s55_s1 = inlined_call_operand.vmem [shape: f32[32,128], index: 1, kind: output, shape index: {}]  }
   0x1   :  { %v8_v0 = vld [vmem:[%s54_s0] sm:$0xff]  ;;  %v9_v1 = vld [vmem:[%s54_s0 + $0x8] sm:$0xff]  ;;  %v10_v2 = vld [vmem:[%s54_s0 + $0x10] sm:$0xff] }
   0x2   :  { %12 = vst [vmem:[%s55_s1] sm:$0xff] %v8_v0  ;;  %13 = vst [vmem:[%s55_s1 + $0x8] sm:$0xff] %v9_v1  ;;  %v11_v3 = vld [vmem:[%s54_s0 + $0x18] sm:$0xff] }
   0x3   :  { %14 = vst [vmem:[%s55_s1 + $0x10] sm:$0xff] %v10_v2  ;;  %15 = vst [vmem:[%s55_s1 + $0x18] sm:$0xff] %v11_v3 }

</bundles_post_ra>
